<compile_context>
chip_gen: v7x
topology: tpu7x:2x2x1
jax: 0.10.0
libtpu: 0.0.40
codegen_flags: <defaults>
</compile_context>

<pallas_src>
import jax
import jax.numpy as jnp
from jax.experimental import pallas as pl
from jax.experimental.pallas import tpu as pltpu

INPUT_SIZE = 3
HIDDEN = (256, 128, 64, 32)
OUTPUT_SIZE = 9
LANE = 128
K1_PAD = 8    # layer-1 contraction dim padded 3 -> 8 so it runs on the MXU
OUT_PAD = 16  # output lanes padded 9 -> 16 (masked vst, ~8x less writeback than 128)


def _round_up(x, m):
    return (x + m - 1) // m * m


def _mlp_kernel(x_ref,
                w1_ref, b1_ref,
                w2_ref, b2_ref,
                w3_ref, b3_ref,
                w4_ref, b4_ref,
                w5_ref, b5_ref,
                o_ref):
    """One batch tile of the full 5-layer MLP. All matmuls on the MXU with f32
    accumulation; biases/ReLU in f32 on the VPU."""
    # --- Layer 1: Linear(3, 256) + ReLU.  x is pre-padded to K=8 with zero
    #     columns and w1 has zero rows, so the MXU result is exact. ---
    x = x_ref[...]                                           # (TM, 8) f32
    h = jnp.dot(x.astype(w1_ref.dtype), w1_ref[...],
                preferred_element_type=jnp.float32) + b1_ref[...]
    h = jnp.maximum(h, 0.0)                                  # (TM, 256)

    # --- Layer 2: Linear(256, 128) + ReLU ---
    h = jnp.dot(h.astype(w2_ref.dtype), w2_ref[...],
                preferred_element_type=jnp.float32) + b2_ref[...]
    h = jnp.maximum(h, 0.0)                                  # (TM, 128)

    # --- Layer 3: Linear(128, 64) + ReLU, padded to 128 output lanes ---
    h = jnp.dot(h.astype(w3_ref.dtype), w3_ref[...],
                preferred_element_type=jnp.float32) + b3_ref[...]
    h = jnp.maximum(h, 0.0)                                  # (TM, 128) [64 live]

    # --- Layer 4: Linear(64, 32) + ReLU, padded to 128 lanes ---
    h = jnp.dot(h.astype(w4_ref.dtype), w4_ref[...],
                preferred_element_type=jnp.float32) + b4_ref[...]
    h = jnp.maximum(h, 0.0)                                  # (TM, 128) [32 live]

    # --- Layer 5: Linear(32, 9), padded to 16 output lanes ---
    out = jnp.dot(h.astype(w5_ref.dtype), w5_ref[...],
                  preferred_element_type=jnp.float32) + b5_ref[...]
    o_ref[...] = out.astype(o_ref.dtype)                     # (TM, 16) [9 live]


def _pack_params(params, weight_dtype):
    """Transpose PyTorch-layout (out, in) weights to (in, out); pad layer-1's
    contraction dim to 8, hidden widths to 128, and the final output width to
    16.  Biases stay f32 as (1, padded_out)."""
    packed = []
    n = len(params)
    for idx, (w_pt, b) in enumerate(params):
        fan_out, fan_in = w_pt.shape
        pin = K1_PAD if idx == 0 else _round_up(fan_in, LANE)
        pout = OUT_PAD if idx == n - 1 else _round_up(fan_out, LANE)
        wp = jnp.zeros((pin, pout), weight_dtype)
        wp = wp.at[:fan_in, :fan_out].set(w_pt.T.astype(weight_dtype))
        bp = jnp.zeros((1, pout), jnp.float32)
        bp = bp.at[0, :fan_out].set(b.astype(jnp.float32))
        packed.append((wp, bp))
    return packed


def inverse_kinematic_mlp(x, params, *, tm=2048, weight_dtype=jnp.bfloat16,
                          out_dtype=jnp.float32):
    """x: (batch, 3) float32.  params: list of (W_pytorch(out,in), b(out,)).

    weight_dtype=jnp.bfloat16 is the recommended default on v5e/v6e/v7x (the
    MXU is bf16-native on all three); pass jnp.float32 for an exact-f32 path.
    out_dtype=jnp.bfloat16 halves output writeback if downstream tolerates it.
    """
    batch = x.shape[0]
    batch8 = _round_up(batch, 8)

    # Tile selection: as big as fits (per-grid-step overhead ~0.35 us), capped
    # at 2048 for v7x's 64 MiB VMEM, and split so the grid has >= 2 tiles when
    # possible (lets ("parallel",) shard across v7x's two TensorCores).
    tm = min(tm, 2048)
    if batch8 >= 16:
        tm = min(tm, _round_up(batch8 // 2, 8))
    else:
        tm = batch8
    batch_p = _round_up(batch, tm)

    # Pad rows to the tile and columns 3 -> 8 so layer 1 runs on the MXU.
    xp = jnp.pad(x, ((0, batch_p - batch), (0, K1_PAD - INPUT_SIZE)))

    packed = _pack_params(params, weight_dtype)

    flat_args = [xp]
    in_specs = [pl.BlockSpec((tm, K1_PAD), lambda i: (i, 0))]
    for wp, bp in packed:
        flat_args += [wp, bp]
        # Constant index_map: weights/biases stay resident across batch tiles.
        in_specs += [pl.BlockSpec(wp.shape, lambda i: (0, 0)),
                     pl.BlockSpec(bp.shape, lambda i: (0, 0))]

    grid = (batch_p // tm,)

    # Advisory cost estimate (padded-lane FLOPs).
    flops = 2 * batch_p * (K1_PAD * 256 + 256 * 128 + 128 * 128
                           + 128 * 128 + 128 * OUT_PAD)
    bytes_accessed = (xp.size * xp.dtype.itemsize
                      + batch_p * OUT_PAD * jnp.dtype(out_dtype).itemsize
                      + sum(w.size * w.dtype.itemsize + b.size * 4
                            for w, b in packed))

    out = pl.pallas_call(
        _mlp_kernel,
        out_shape=jax.ShapeDtypeStruct((batch_p, OUT_PAD), out_dtype),
        grid=grid,
        in_specs=in_specs,
        out_specs=pl.BlockSpec((tm, OUT_PAD), lambda i: (i, 0)),
        compiler_params=pltpu.CompilerParams(
            dimension_semantics=("parallel",),       # shard tiles over v7x's 2 TCs
            vmem_limit_bytes=32 * 1024 * 1024),      # safe on v5e/v6e and v7x (64 MiB)
        cost_estimate=pl.CostEstimate(
            flops=flops, transcendentals=0, bytes_accessed=bytes_accessed),
    )(*flat_args)

    return out[:batch, :OUTPUT_SIZE]


def init_params(key):
    """PyTorch nn.Linear-style init: weight (out, in), bias (out,), U(-1/sqrt(in), 1/sqrt(in))."""
    dims = (INPUT_SIZE,) + HIDDEN + (OUTPUT_SIZE,)
    params = []
    for i in range(len(dims) - 1):
        fan_in, fan_out = dims[i], dims[i + 1]
        key, kw, kb = jax.random.split(key, 3)
        bound = 1.0 / jnp.sqrt(fan_in)
        w_pt = jax.random.uniform(kw, (fan_out, fan_in), jnp.float32, -bound, bound)
        b = jax.random.uniform(kb, (fan_out,), jnp.float32, -bound, bound)
        params.append((w_pt, b))
    return params


def reference_mlp(x, params):
    """Pure-JAX reference matching the PyTorch forward (true-f32 matmuls)."""
    h = x
    for i, (w_pt, b) in enumerate(params):
        h = jnp.dot(h, w_pt.T, precision=jax.lax.Precision.HIGHEST) + b
        if i < len(params) - 1:
            h = jnp.maximum(h, 0.0)
    return h


if __name__ == "__main__":
    key = jax.random.PRNGKey(0)
    key, kx = jax.random.split(key)

    batch = 8
    x = jax.random.normal(kx, (batch, INPUT_SIZE), jnp.float32)
    params = init_params(key)

    ref = reference_mlp(x, params)

    # f32-weight validation path.
    out_f32 = jax.block_until_ready(
        inverse_kinematic_mlp(x, params, weight_dtype=jnp.float32))
    assert out_f32.shape == (batch, OUTPUT_SIZE), out_f32.shape
    assert jnp.allclose(out_f32, ref, atol=5e-3, rtol=5e-3), (
        f"f32 path max abs diff: {jnp.max(jnp.abs(out_f32 - ref))}")

    # Default path: bf16 weights/activations on the MXU, f32 accumulation.
    out_bf16 = jax.block_until_ready(inverse_kinematic_mlp(x, params))
    assert out_bf16.shape == (batch, OUTPUT_SIZE), out_bf16.shape
    assert jnp.allclose(out_bf16, ref, atol=5e-2, rtol=5e-2), (
        f"bf16 path max abs diff: {jnp.max(jnp.abs(out_bf16 - ref))}")

    print("KERNEL_OK")
</pallas_src>

<mosaic_0001>
module attributes {stable_mosaic.version = 11 : i64} {
  func.func @_mlp_kernel(%arg0: i32, %arg1: memref<8x8xf32, #tpu.memory_space<vmem>>, %arg2: memref<8x256xf32, #tpu.memory_space<vmem>>, %arg3: memref<1x256xf32, #tpu.memory_space<vmem>>, %arg4: memref<256x128xf32, #tpu.memory_space<vmem>>, %arg5: memref<1x128xf32, #tpu.memory_space<vmem>>, %arg6: memref<128x128xf32, #tpu.memory_space<vmem>>, %arg7: memref<1x128xf32, #tpu.memory_space<vmem>>, %arg8: memref<128x128xf32, #tpu.memory_space<vmem>>, %arg9: memref<1x128xf32, #tpu.memory_space<vmem>>, %arg10: memref<128x16xf32, #tpu.memory_space<vmem>>, %arg11: memref<1x16xf32, #tpu.memory_space<vmem>>, %arg12: memref<8x16xf32, #tpu.memory_space<vmem>>) attributes {dimension_semantics = [#tpu.dimension_semantics<parallel>], iteration_bounds = array<i64: 1>, scalar_prefetch = 0 : i64, scratch_operands = 0 : i64, tpu.core_type = #tpu.core_type<tc>, window_params = [{transform_indices = @transform_0, window_bounds = array<i64: 8, 8>}, {pipeline_mode = #tpu.pipeline_mode<synchronous>, transform_indices = @transform_1, window_bounds = array<i64: 8, 256>}, {pipeline_mode = #tpu.pipeline_mode<synchronous>, transform_indices = @transform_2, window_bounds = array<i64: 1, 256>}, {pipeline_mode = #tpu.pipeline_mode<synchronous>, transform_indices = @transform_3, window_bounds = array<i64: 256, 128>}, {pipeline_mode = #tpu.pipeline_mode<synchronous>, transform_indices = @transform_4, window_bounds = array<i64: 1, 128>}, {pipeline_mode = #tpu.pipeline_mode<synchronous>, transform_indices = @transform_5, window_bounds = array<i64: 128, 128>}, {pipeline_mode = #tpu.pipeline_mode<synchronous>, transform_indices = @transform_6, window_bounds = array<i64: 1, 128>}, {pipeline_mode = #tpu.pipeline_mode<synchronous>, transform_indices = @transform_7, window_bounds = array<i64: 128, 128>}, {pipeline_mode = #tpu.pipeline_mode<synchronous>, transform_indices = @transform_8, window_bounds = array<i64: 1, 128>}, {pipeline_mode = #tpu.pipeline_mode<synchronous>, transform_indices = @transform_9, window_bounds = array<i64: 128, 16>}, {pipeline_mode = #tpu.pipeline_mode<synchronous>, transform_indices = @transform_10, window_bounds = array<i64: 1, 16>}, {transform_indices = @transform_11, window_bounds = array<i64: 8, 16>}]} {
    %c0 = arith.constant 0 : index
    %c0_0 = arith.constant 0 : index
    %0 = vector.load %arg1[%c0, %c0_0] : memref<8x8xf32, #tpu.memory_space<vmem>>, vector<8x8xf32>
    %c0_1 = arith.constant 0 : index
    %c0_2 = arith.constant 0 : index
    %1 = vector.load %arg2[%c0_1, %c0_2] : memref<8x256xf32, #tpu.memory_space<vmem>>, vector<8x256xf32>
    %cst = arith.constant dense<0.000000e+00> : vector<8x256xf32>
    %2 = tpu.matmul %0, %1, %cst {dimension_numbers = #tpu.dot_dimension_numbers<[1], [0], [0], [1], [0, 0, 1, 1], [], []>} : vector<8x8xf32>, vector<8x256xf32>, vector<8x256xf32> -> vector<8x256xf32>
    %c0_3 = arith.constant 0 : index
    %c0_4 = arith.constant 0 : index
    %3 = vector.load %arg3[%c0_3, %c0_4] : memref<1x256xf32, #tpu.memory_space<vmem>>, vector<1x256xf32>
    %4 = vector.broadcast %3 : vector<1x256xf32> to vector<8x256xf32>
    %5 = arith.addf %2, %4 : vector<8x256xf32>
    %cst_5 = arith.constant 0.000000e+00 : f32
    %6 = vector.broadcast %cst_5 : f32 to vector<8x256xf32>
    %7 = arith.maximumf %5, %6 : vector<8x256xf32>
    %c0_6 = arith.constant 0 : index
    %c0_7 = arith.constant 0 : index
    %8 = vector.load %arg4[%c0_6, %c0_7] : memref<256x128xf32, #tpu.memory_space<vmem>>, vector<256x128xf32>
    %cst_8 = arith.constant dense<0.000000e+00> : vector<8x128xf32>
    %9 = tpu.matmul %7, %8, %cst_8 {dimension_numbers = #tpu.dot_dimension_numbers<[1], [0], [0], [1], [0, 0, 1, 1], [], []>} : vector<8x256xf32>, vector<256x128xf32>, vector<8x128xf32> -> vector<8x128xf32>
    %c0_9 = arith.constant 0 : index
    %c0_10 = arith.constant 0 : index
    %10 = vector.load %arg5[%c0_9, %c0_10] : memref<1x128xf32, #tpu.memory_space<vmem>>, vector<1x128xf32>
    %11 = vector.broadcast %10 : vector<1x128xf32> to vector<8x128xf32>
    %12 = arith.addf %9, %11 : vector<8x128xf32>
    %cst_11 = arith.constant 0.000000e+00 : f32
    %13 = vector.broadcast %cst_11 : f32 to vector<8x128xf32>
    %14 = arith.maximumf %12, %13 : vector<8x128xf32>
    %c0_12 = arith.constant 0 : index
    %c0_13 = arith.constant 0 : index
    %15 = vector.load %arg6[%c0_12, %c0_13] : memref<128x128xf32, #tpu.memory_space<vmem>>, vector<128x128xf32>
    %cst_14 = arith.constant dense<0.000000e+00> : vector<8x128xf32>
    %16 = tpu.matmul %14, %15, %cst_14 {dimension_numbers = #tpu.dot_dimension_numbers<[1], [0], [0], [1], [0, 0, 1, 1], [], []>} : vector<8x128xf32>, vector<128x128xf32>, vector<8x128xf32> -> vector<8x128xf32>
    %c0_15 = arith.constant 0 : index
    %c0_16 = arith.constant 0 : index
    %17 = vector.load %arg7[%c0_15, %c0_16] : memref<1x128xf32, #tpu.memory_space<vmem>>, vector<1x128xf32>
    %18 = vector.broadcast %17 : vector<1x128xf32> to vector<8x128xf32>
    %19 = arith.addf %16, %18 : vector<8x128xf32>
    %cst_17 = arith.constant 0.000000e+00 : f32
    %20 = vector.broadcast %cst_17 : f32 to vector<8x128xf32>
    %21 = arith.maximumf %19, %20 : vector<8x128xf32>
    %c0_18 = arith.constant 0 : index
    %c0_19 = arith.constant 0 : index
    %22 = vector.load %arg8[%c0_18, %c0_19] : memref<128x128xf32, #tpu.memory_space<vmem>>, vector<128x128xf32>
    %cst_20 = arith.constant dense<0.000000e+00> : vector<8x128xf32>
    %23 = tpu.matmul %21, %22, %cst_20 {dimension_numbers = #tpu.dot_dimension_numbers<[1], [0], [0], [1], [0, 0, 1, 1], [], []>} : vector<8x128xf32>, vector<128x128xf32>, vector<8x128xf32> -> vector<8x128xf32>
    %c0_21 = arith.constant 0 : index
    %c0_22 = arith.constant 0 : index
    %24 = vector.load %arg9[%c0_21, %c0_22] : memref<1x128xf32, #tpu.memory_space<vmem>>, vector<1x128xf32>
    %25 = vector.broadcast %24 : vector<1x128xf32> to vector<8x128xf32>
    %26 = arith.addf %23, %25 : vector<8x128xf32>
    %cst_23 = arith.constant 0.000000e+00 : f32
    %27 = vector.broadcast %cst_23 : f32 to vector<8x128xf32>
    %28 = arith.maximumf %26, %27 : vector<8x128xf32>
    %c0_24 = arith.constant 0 : index
    %c0_25 = arith.constant 0 : index
    %29 = vector.load %arg10[%c0_24, %c0_25] : memref<128x16xf32, #tpu.memory_space<vmem>>, vector<128x16xf32>
    %cst_26 = arith.constant dense<0.000000e+00> : vector<8x16xf32>
    %30 = tpu.matmul %28, %29, %cst_26 {dimension_numbers = #tpu.dot_dimension_numbers<[1], [0], [0], [1], [0, 0, 1, 1], [], []>} : vector<8x128xf32>, vector<128x16xf32>, vector<8x16xf32> -> vector<8x16xf32>
    %c0_27 = arith.constant 0 : index
    %c0_28 = arith.constant 0 : index
    %31 = vector.load %arg11[%c0_27, %c0_28] : memref<1x16xf32, #tpu.memory_space<vmem>>, vector<1x16xf32>
    %32 = vector.broadcast %31 : vector<1x16xf32> to vector<8x16xf32>
    %33 = arith.addf %30, %32 : vector<8x16xf32>
    %c0_29 = arith.constant 0 : index
    %c0_30 = arith.constant 0 : index
    %34 = vector.load %arg12[%c0_29, %c0_30] : memref<8x16xf32, #tpu.memory_space<vmem>>, vector<8x16xf32>
    tpu.vector_store %arg12[%c0_29, %c0_30], %33 {strides = array<i32>} : memref<8x16xf32, #tpu.memory_space<vmem>>, vector<8x16xf32>,
    return
  }
  func.func @transform_0(%arg0: i32) -> (i32, i32) {
    %c0_i32 = arith.constant 0 : i32
    %c0_i32_0 = arith.constant 0 : i32
    return %arg0, %c0_i32 : i32, i32
  }
  func.func @transform_1(%arg0: i32) -> (i32, i32) {
    %c0_i32 = arith.constant 0 : i32
    %c0_i32_0 = arith.constant 0 : i32
    %c0_i32_1 = arith.constant 0 : i32
    return %c0_i32, %c0_i32_0 : i32, i32
  }
  func.func @transform_2(%arg0: i32) -> (i32, i32) {
    %c0_i32 = arith.constant 0 : i32
    %c0_i32_0 = arith.constant 0 : i32
    %c0_i32_1 = arith.constant 0 : i32
    return %c0_i32, %c0_i32_0 : i32, i32
  }
  func.func @transform_3(%arg0: i32) -> (i32, i32) {
    %c0_i32 = arith.constant 0 : i32
    %c0_i32_0 = arith.constant 0 : i32
    %c0_i32_1 = arith.constant 0 : i32
    return %c0_i32, %c0_i32_0 : i32, i32
  }
  func.func @transform_4(%arg0: i32) -> (i32, i32) {
    %c0_i32 = arith.constant 0 : i32
    %c0_i32_0 = arith.constant 0 : i32
    %c0_i32_1 = arith.constant 0 : i32
    return %c0_i32, %c0_i32_0 : i32, i32
  }
  func.func @transform_5(%arg0: i32) -> (i32, i32) {
    %c0_i32 = arith.constant 0 : i32
    %c0_i32_0 = arith.constant 0 : i32
    %c0_i32_1 = arith.constant 0 : i32
    return %c0_i32, %c0_i32_0 : i32, i32
  }
  func.func @transform_6(%arg0: i32) -> (i32, i32) {
    %c0_i32 = arith.constant 0 : i32
    %c0_i32_0 = arith.constant 0 : i32
    %c0_i32_1 = arith.constant 0 : i32
    return %c0_i32, %c0_i32_0 : i32, i32
  }
  func.func @transform_7(%arg0: i32) -> (i32, i32) {
    %c0_i32 = arith.constant 0 : i32
    %c0_i32_0 = arith.constant 0 : i32
    %c0_i32_1 = arith.constant 0 : i32
    return %c0_i32, %c0_i32_0 : i32, i32
  }
  func.func @transform_8(%arg0: i32) -> (i32, i32) {
    %c0_i32 = arith.constant 0 : i32
    %c0_i32_0 = arith.constant 0 : i32
    %c0_i32_1 = arith.constant 0 : i32
    return %c0_i32, %c0_i32_0 : i32, i32
  }
  func.func @transform_9(%arg0: i32) -> (i32, i32) {
    %c0_i32 = arith.constant 0 : i32
    %c0_i32_0 = arith.constant 0 : i32
    %c0_i32_1 = arith.constant 0 : i32
    return %c0_i32, %c0_i32_0 : i32, i32
  }
  func.func @transform_10(%arg0: i32) -> (i32, i32) {
    %c0_i32 = arith.constant 0 : i32
    %c0_i32_0 = arith.constant 0 : i32
    %c0_i32_1 = arith.constant 0 : i32
    return %c0_i32, %c0_i32_0 : i32, i32
  }
  func.func @transform_11(%arg0: i32) -> (i32, i32) {
    %c0_i32 = arith.constant 0 : i32
    %c0_i32_0 = arith.constant 0 : i32
    return %arg0, %c0_i32 : i32, i32
  }
}

</mosaic_0001>

<bundles_post_ra>
// kernel: tpu_custom_call.1
= control target key start
LH: loop header
LB: loop body
LE: loop exit
PB: predicated region body
PF: predicated region fallthrough
CT: control target
= control target key end

     0   :  { %16 = vsyncpa [#allocation3], 0  ;;  %s1203_s0 = inlined_call_operand.vmem [shape: f32[8,8], index: 0, kind: input, shape index: {}]   ;;  %s1204_s1 = inlined_call_operand.vmem [shape: f32[8,256], index: 1, kind: input, shape index: {}]   ;;  %s1205_s2 = inlined_call_operand.vmem [shape: f32[1,256], index: 2, kind: input, shape index: {}]   ;;  %s1206_s3 = inlined_call_operand.hbm [shape: f32[256,128], index: 3, kind: input, shape index: {}]   ;;  %s1207_s4 = inlined_call_operand.vmem [shape: f32[1,128], index: 4, kind: input, shape index: {}]   ;;  %s1208_s5 = inlined_call_operand.vmem [shape: f32[128,128], index: 5, kind: input, shape index: {}]   ;;  %s1209_s6 = inlined_call_operand.vmem [shape: f32[1,128], index: 6, kind: input, shape index: {}]   ;;  %s1210_s7 = inlined_call_operand.hbm [shape: f32[128,128], index: 7, kind: input, shape index: {}]   ;;  %s1211_s8 = inlined_call_operand.vmem [shape: f32[1,128], index: 8, kind: input, shape index: {}]   ;;  %s1212_s9 = inlined_call_operand.vmem [shape: f32[128,16], index: 9, kind: input, shape index: {}]   ;;  %s1213_s10 = inlined_call_operand.vmem [shape: f32[1,16], index: 10, kind: input, shape index: {}]   ;;  %s1214_s11 = inlined_call_operand.hbm [shape: f32[8,16], index: 11, kind: output, shape index: {}]  }
   0x1   :  { %17 = vsyncpa [#allocation6], 0 }
   0x2   :  { %18 = vsyncpa [#allocation4], 0  ;;  %s948_s17 = smov [#allocation2]   ;;  %s876_s21 = scalar_lea.hbm %s1206_s3, 4096 }
   0x3   :  { %s30_s18 = sshll.u32 %s948_s17, 4  ;;  %p877_p0 = scmp.ne.s32.totalorder %s1206_s3, %s876_s21  ;;  %s31_s18 = int_to_ptr.vmem [resolvable:$true] %s30_s18 }
   0x4   :  { %p880_p1 = scmp.lt.u32.totalorder %s876_s21, %s1206_s3 }
   0x6   :  { %p882_p2 = pnand %p880_p1, %p877_p0 }
   0x8   :  { %885 = shalt.err (!%p882_p2)
}
   0x9   :  { %s886_s26 = scalar_lea.vmem %s31_s18, 4096  ;;  %p891_p4 = scmp.lt.s32.totalorder %s31_s18, %s31_s18 }
   0xa   :  { %p887_p3 = scmp.ne.s32.totalorder %s31_s18, %s886_s26  ;;  %p892_p5 = scmp.lt.s32.totalorder %s886_s26, %s886_s26 }
   0xc   :  { %p893_p6 = por %p892_p5, %p891_p4 }
   0xe   :  { %p894_p7 = pnand %p893_p6, %p887_p3 }
  0x10   :  { %897 = shalt.err (!%p894_p7)
}
  0x11   :  { %s949_s27 = smov 128   ;;  %s950_s28 = smov 8  }
  0x12   :  { %36 = dma.hbm_to_vmem [thread:$0]  %s1206_s3, 4096, %s31_s18, [#allocation3], %s949_s27, %s949_s27, %s950_s28  }
  0x13   :  { %s951_s12 = smov [#allocation5]   ;;  %s898_s16 = scalar_lea.hbm %s1210_s7, 2048 }
  0x14   :  { %s48_s13 = sshll.u32 %s951_s12, 4  ;;  %p899_p8 = scmp.ne.s32.totalorder %s1210_s7, %s898_s16  ;;  %s49_s13 = int_to_ptr.vmem [resolvable:$true] %s48_s13 }
  0x15   :  { %p902_p9 = scmp.lt.u32.totalorder %s898_s16, %s1210_s7 }
  0x17   :  { %p904_p10 = pnand %p902_p9, %p899_p8 }
  0x19   :  { %907 = shalt.err (!%p904_p10)
}
  0x1a   :  { %s908_s22 = scalar_lea.vmem %s49_s13, 2048  ;;  %p913_p12 = scmp.lt.s32.totalorder %s49_s13, %s49_s13 }
  0x1b   :  { %p909_p11 = scmp.ne.s32.totalorder %s49_s13, %s908_s22  ;;  %p914_p13 = scmp.lt.s32.totalorder %s908_s22, %s908_s22 }
  0x1d   :  { %p915_p0 = por %p914_p13, %p913_p12 }
  0x1f   :  { %p916_p1 = pnand %p915_p0, %p909_p11 }
  0x21   :  { %919 = shalt.err (!%p916_p1)
}
  0x22   :  { %54 = dma.hbm_to_vmem [thread:$0]  %s1210_s7, 2048, %s49_s13, [#allocation6], %s949_s27, %s949_s27, %s950_s28  }
  0x23   :  { %942 = dma.done.wait [#allocation3], 4096  }
  0x24   :  { %943 = vsyncadd [#allocation3], 4294963200 }
  0x25   :  { %944 = dma.done.wait [#allocation6], 2048  }
  0x26   :  { %945 = vsyncadd [#allocation6], 4294965248  ;;  %v952_v0 = vmov 0.0   ;;  %v69_v1 = vld [vmem:[%s1204_s1 + $0x8] sm:$0xff]  ;;  %v68_v2 = vld [vmem:[%s1204_s1] sm:$0xff]  ;;  %vm82_vm0 = vcmask 64512  }
  0x27   :  { %150 = vmatprep.mubr.f32.mxu0 %v952_v0  ;;  %v67_v3 = vld [vmem:[%s1203_s0] sm:$0xff]  ;;  %86 = vmatprep.subr.mxu0 %v69_v1  ;;  %v176_v5 = vld [vmem:[#allocation2 + $0x88] sm:$0xff]  ;;  %v177_v9 = vld [vmem:[#allocation2 + $0x90] sm:$0xff]  ;;  %v953_v55 = vmov 0.0|0.0   ;;  %vm954_vm1 = vmmov 0   ;;  %s955_s29 = smov [#allocation7]  }
  0x28   :  { %v175_v4 = vld [vmem:[#allocation2 + $0x80] sm:$0xff]  ;;  %87 = vmatpush1.msra.mxu0 %v68_v2  ;;  %v160_v8 = vld [vmem:[#allocation2 + $0x8] sm:$0xff]  ;;  %v178_v10 = vld [vmem:[#allocation2 + $0x98] sm:$0xff]  ;;  %s558_s30 = sshll.u32 %s955_s29, 4  ;;  %vm550_vm2 = vcmask 130048   ;;  %s559_s30 = int_to_ptr.vmem [resolvable:$true] %s558_s30 }
  0x29   :  { %v159_v6 = vld [vmem:[#allocation2] sm:$0xff]  ;;  %v764_v7 = vpack.c.bf16 %v176_v5, %v175_v4  ;;  %568 = vmatmul.mubr.msk.f32.vlgmr.msra.gmra.mrb[0].mxu0 %vm82_vm0, %v67_v3  ;;  %v768_v12 = vpack.c.bf16 %v178_v10, %v177_v9  ;;  %v161_v13 = vld [vmem:[#allocation2 + $0x10] sm:$0xff]  ;;  %v162_v14 = vld [vmem:[#allocation2 + $0x18] sm:$0xff]  ;;  %796 = vmatprep.subr.bf16.mxu0 %v953_v55  ;;  %p925_p3 = scmp.lt.s32.totalorder %s559_s30, %s559_s30 }
  0x2a   :  { %v766_v11 = vpack.c.bf16 %v160_v8, %v159_v6  ;;  %v179_v15 = vld [vmem:[#allocation2 + $0xa0] sm:$0xff]  ;;  %v180_v16 = vld [vmem:[#allocation2 + $0xa8] sm:$0xff]  ;;  %v770_v17 = vpack.c.bf16 %v162_v14, %v161_v13  ;;  %v181_v21 = vld [vmem:[#allocation2 + $0xb0] sm:$0xff]  ;;  %v72_v8 = vlaneseq  ;;  %691 = vmatprep.mubr.msk.f32.mxu0 %vm954_vm1, %v952_v0 }
  0x2b   :  { %765 = vmatprep.subr.bf16.mxu1 %v764_v7  ;;  %v772_v18 = vpack.c.bf16 %v180_v16, %v179_v15  ;;  %v163_v19 = vld [vmem:[#allocation2 + $0x20] sm:$0xff]  ;;  %v164_v20 = vld [vmem:[#allocation2 + $0x28] sm:$0xff]  ;;  %v182_v22 = vld [vmem:[#allocation2 + $0xb8] sm:$0xff] }
  0x2c   :  { %767 = vmatpush3.bf16.msra.mxu1 %v766_v11  ;;  %v774_v23 = vpack.c.bf16 %v164_v20, %v163_v19  ;;  %v776_v24 = vpack.c.bf16 %v182_v22, %v181_v21  ;;  %v165_v25 = vld [vmem:[#allocation2 + $0x30] sm:$0xff]  ;;  %v166_v26 = vld [vmem:[#allocation2 + $0x38] sm:$0xff]  ;;  %v183_v27 = vld [vmem:[#allocation2 + $0xc0] sm:$0xff]  ;;  %v73_v9 = vshrl.u32 %v72_v8, 7 }
  0x2d   :  { %769 = vmatprep.subr.bf16.mxu1 %v768_v12  ;;  %v184_v28 = vld [vmem:[#allocation2 + $0xc8] sm:$0xff]  ;;  %v778_v29 = vpack.c.bf16 %v166_v26, %v165_v25  ;;  %v167_v31 = vld [vmem:[#allocation2 + $0x40] sm:$0xff]  ;;  %v185_v33 = vld [vmem:[#allocation2 + $0xd0] sm:$0xff] }
  0x2e   :  { %v780_v30 = vpack.c.bf16 %v184_v28, %v183_v27  ;;  %v168_v32 = vld [vmem:[#allocation2 + $0x48] sm:$0xff]  ;;  %v186_v34 = vld [vmem:[#allocation2 + $0xd8] sm:$0xff]  ;;  %v169_v37 = vld [vmem:[#allocation2 + $0x50] sm:$0xff]  ;;  %v74_v10 = vsub.s32 0, %v73_v9  ;;  %v78_v12 = vsub.s32 1, %v73_v9 }
  0x2f   :  { %v782_v35 = vpack.c.bf16 %v168_v32, %v167_v31  ;;  %v784_v36 = vpack.c.bf16 %v186_v34, %v185_v33  ;;  %v170_v38 = vld [vmem:[#allocation2 + $0x58] sm:$0xff]  ;;  %v187_v39 = vld [vmem:[#allocation2 + $0xe0] sm:$0xff]  ;;  %v188_v40 = vld [vmem:[#allocation2 + $0xe8] sm:$0xff] }
  0x30   :  { %771 = vmatpush3.bf16.msra.mxu1 %v770_v17  ;;  %v786_v41 = vpack.c.bf16 %v170_v38, %v169_v37  ;;  %v788_v42 = vpack.c.bf16 %v188_v40, %v187_v39  ;;  %v171_v43 = vld [vmem:[#allocation2 + $0x60] sm:$0xff]  ;;  %v172_v44 = vld [vmem:[#allocation2 + $0x68] sm:$0xff]  ;;  %v189_v46 = vld [vmem:[#allocation2 + $0xf0] sm:$0xff] }
  0x31   :  { %773 = vmatprep.subr.bf16.mxu1 %v772_v18  ;;  %v790_v45 = vpack.c.bf16 %v172_v44, %v171_v43  ;;  %v190_v47 = vld [vmem:[#allocation2 + $0xf8] sm:$0xff]  ;;  %v173_v49 = vld [vmem:[#allocation2 + $0x70] sm:$0xff]  ;;  %v269_v52 = vld [vmem:[%s1208_s5] sm:$0xff] }
  0x32   :  { %v792_v48 = vpack.c.bf16 %v190_v47, %v189_v46  ;;  %v174_v50 = vld [vmem:[#allocation2 + $0x78] sm:$0xff]  ;;  %v270_v53 = vld [vmem:[%s1208_s5 + $0x8] sm:$0xff]  ;;  %v271_v54 = vld [vmem:[%s1208_s5 + $0x10] sm:$0xff] }
  0x33   :  { %v794_v51 = vpack.c.bf16 %v174_v50, %v173_v49  ;;  %v797_v56 = vpack.c.bf16 %v270_v53, %v269_v52  ;;  %v272_v57 = vld [vmem:[%s1208_s5 + $0x18] sm:$0xff]  ;;  %v273_v59 = vld [vmem:[%s1208_s5 + $0x20] sm:$0xff]  ;;  %v274_v60 = vld [vmem:[%s1208_s5 + $0x28] sm:$0xff] }
  0x34   :  { %775 = vmatpush3.bf16.msra.mxu1 %v774_v23  ;;  %v800_v58 = vpack.c.bf16 %v272_v57, %v271_v54  ;;  %v803_v61 = vpack.c.bf16 %v274_v60, %v273_v59  ;;  %v275_v62 = vld [vmem:[%s1208_s5 + $0x30] sm:$0xff]  ;;  %v276_v63 = vld [vmem:[%s1208_s5 + $0x38] sm:$0xff]  ;;  %v277_v2 = vld [vmem:[%s1208_s5 + $0x40] sm:$0xff] }
  0x35   :  { %777 = vmatprep.subr.bf16.mxu1 %v776_v24  ;;  %798 = vmatpush3.bf16.msra.mxu0 %v797_v56  ;;  %v806_v1 = vpack.c.bf16 %v276_v63, %v275_v62  ;;  %v278_v3 = vld [vmem:[%s1208_s5 + $0x48] sm:$0xff]  ;;  %v279_v5 = vld [vmem:[%s1208_s5 + $0x50] sm:$0xff]  ;;  %v280_v6 = vld [vmem:[%s1208_s5 + $0x58] sm:$0xff] }
  0x36   :  { %799 = vmatprep.subr.bf16.mxu0 %v953_v55  ;;  %v809_v4 = vpack.c.bf16 %v278_v3, %v277_v2  ;;  %v812_v7 = vpack.c.bf16 %v280_v6, %v279_v5  ;;  %v70_v11 = vld [vmem:[%s1205_s2] sm:$0x3]  ;;  %v282_v22 = vld [vmem:[%s1208_s5 + $0x68] sm:$0xff]  ;;  %v283_v24 = vld [vmem:[%s1208_s5 + $0x70] sm:$0xff] }
  0x37   :  { %v75_v13 = vrot.slane %v70_v11, %v74_v10  ;;  %v79_v14 = vrot.slane %v70_v11, %v78_v12  ;;  %v281_v21 = vld [vmem:[%s1208_s5 + $0x60] sm:$0xff]  ;;  %v284_v25 = vld [vmem:[%s1208_s5 + $0x78] sm:$0xff]  ;;  %v364_v28 = vld [vmem:[#allocation5 + $0x8] sm:$0xff] }
  0x38   :  { %779 = vmatpush3.bf16.msra.mxu1 %v778_v29  ;;  %v815_v23 = vpack.c.bf16 %v282_v22, %v281_v21  ;;  %v818_v26 = vpack.c.bf16 %v284_v25, %v283_v24  ;;  %v363_v27 = vld [vmem:[#allocation5] sm:$0xff]  ;;  %v365_v29 = vld [vmem:[#allocation5 + $0x10] sm:$0xff]  ;;  %v366_v31 = vld [vmem:[#allocation5 + $0x18] sm:$0xff] }
  0x39   :  { %781 = vmatprep.subr.bf16.mxu1 %v780_v30  ;;  %801 = vmatpush3.bf16.msra.mxu0 %v800_v58  ;;  %v821_v30 = vpack.c.bf16 %v364_v28, %v363_v27  ;;  %v824_v32 = vpack.c.bf16 %v366_v31, %v365_v29  ;;  %v367_v33 = vld [vmem:[#allocation5 + $0x20] sm:$0xff]  ;;  %v368_v34 = vld [vmem:[#allocation5 + $0x28] sm:$0xff]  ;;  %v370_v37 = vld [vmem:[#allocation5 + $0x38] sm:$0xff] }
  0x3a   :  { %802 = vmatprep.subr.bf16.mxu0 %v953_v55  ;;  %v371_v39 = vld [vmem:[#allocation5 + $0x40] sm:$0xff]  ;;  %v372_v40 = vld [vmem:[#allocation5 + $0x48] sm:$0xff]  ;;  %v374_v43 = vld [vmem:[#allocation5 + $0x58] sm:$0xff] }
  0x3b   :  { %v376_v46 = vld [vmem:[#allocation5 + $0x68] sm:$0xff]  ;;  %v569_v49 = vld [vmem:[%s1207_s4] ss:$0 sm:$0xff]  ;;  %v377_v54 = vld [vmem:[#allocation5 + $0x70] sm:$0xff] }
  0x3c   :  { %783 = vmatpush3.bf16.msra.mxu1 %v782_v35  ;;  %v827_v35 = vpack.c.bf16 %v368_v34, %v367_v33  ;;  %v378_v56 = vld [vmem:[#allocation5 + $0x78] sm:$0xff]  ;;  %v457_v58 = vld [vmem:[%s1212_s9] sm:$0xff]  ;;  %v458_v59 = vld [vmem:[%s1212_s9 + $0x8] sm:$0xff] }
  0x3d   :  { %785 = vmatprep.subr.bf16.mxu1 %v784_v36  ;;  %804 = vmatpush3.bf16.msra.mxu0 %v803_v61  ;;  %v369_v36 = vld [vmem:[#allocation5 + $0x30] sm:$0xff]  ;;  %v842_v57 = vpack.c.bf16 %v378_v56, %v377_v54  ;;  %v845_v61 = vpack.c.bf16 %v458_v59, %v457_v58  ;;  %v461_v63 = vld [vmem:[%s1212_s9 + $0x20] sm:$0xff]  ;;  %v468_v10 = vld [vmem:[%s1212_s9 + $0x58] sm:$0xff] }
  0x3e   :  { %805 = vmatprep.subr.bf16.mxu0 %v953_v55  ;;  %v830_v38 = vpack.c.bf16 %v370_v37, %v369_v36  ;;  %v459_v60 = vld [vmem:[%s1212_s9 + $0x10] sm:$0xff]  ;;  %v465_v6 = vld [vmem:[%s1212_s9 + $0x40] sm:$0xff]  ;;  %v472_v21 = vld [vmem:[%s1212_s9 + $0x78] sm:$0xff] }
  0x3f   :  { %v463_v3 = vld [vmem:[%s1212_s9 + $0x30] sm:$0xff]  ;;  %v469_v12 = vld [vmem:[%s1212_s9 + $0x60] sm:$0xff] }
  0x40   :  { %787 = vmatpush3.bf16.msra.mxu1 %v786_v41  ;;  %v833_v41 = vpack.c.bf16 %v372_v40, %v371_v39  ;;  %v467_v9 = vld [vmem:[%s1212_s9 + $0x50] sm:$0xff]  ;;  %v572_v27 = vld [vmem:[%s1213_s10] ss:$0 sm:$0xff] }
  0x41   :  { %789 = vmatprep.subr.bf16.mxu1 %v788_v42  ;;  %807 = vmatpush3.bf16.msra.mxu0 %v806_v1  ;;  %v373_v42 = vld [vmem:[#allocation5 + $0x50] sm:$0xff]  ;;  %v462_v1 = vld [vmem:[%s1212_s9 + $0x28] sm:$0xff]  ;;  %v860_v11 = vpack.c.bf16 %v468_v10, %v467_v9 }
  0x42   :  { %808 = vmatprep.subr.bf16.mxu0 %v953_v55  ;;  %v836_v44 = vpack.c.bf16 %v374_v43, %v373_v42  ;;  %v851_v2 = vpack.c.bf16 %v462_v1, %v461_v63 }
  0x44   :  { %791 = vmatpush3.bf16.msra.mxu1 %v790_v45  ;;  %v375_v45 = vld [vmem:[#allocation5 + $0x60] sm:$0xff] }
  0x45   :  { %793 = vmatprep.subr.bf16.mxu1 %v792_v48  ;;  %810 = vmatpush3.bf16.msra.mxu0 %v809_v4  ;;  %v839_v47 = vpack.c.bf16 %v376_v46, %v375_v45  ;;  %v464_v4 = vld [vmem:[%s1212_s9 + $0x38] sm:$0xff] }
  0x46   :  { %811 = vmatprep.subr.bf16.mxu0 %v953_v55  ;;  %v854_v5 = vpack.c.bf16 %v464_v4, %v463_v3 }
  0x48   :  { %795 = vmatpush3.bf16.msra.mxu1 %v794_v51 }
  0x49   :  { %820 = vmatprep.subr.bf16.mxu1 %v953_v55  ;;  %813 = vmatpush3.bf16.msra.mxu0 %v812_v7  ;;  %v466_v7 = vld [vmem:[%s1212_s9 + $0x48] sm:$0xff] }
  0x4a   :  { %814 = vmatprep.subr.bf16.mxu0 %v953_v55  ;;  %v857_v8 = vpack.c.bf16 %v466_v7, %v465_v6 }
  0x4d   :  { %816 = vmatpush3.bf16.msra.mxu0 %v815_v23 }
  0x4e   :  { %817 = vmatprep.subr.bf16.mxu0 %v953_v55 }
  0x51   :  { %819 = vmatpush3.bf16.msra.mxu0 %v818_v26 }
  0x52   :  { %844 = vmatprep.subr.bf16.mxu0 %v953_v55 }
  0xfc   :  { %v152_v15 = vpop.f32.mrb[0].mxu0 }
  0xfd   :  { %v153_v16 = vadd.f32 %v152_v15, %v75_v13  ;;  %v154_v17 = vpop.f32.mrb[1].mxu0  ;;  %v470_v13 = vld [vmem:[%s1212_s9 + $0x68] sm:$0xff]  ;;  %v570_v15 = vld [vmem:[%s1209_s6] ss:$0 sm:$0xff] }
  0xfe   :  { %v155_v18 = vadd.f32 %v154_v17, %v79_v14  ;;  %v863_v14 = vpack.c.bf16 %v470_v13, %v469_v12 }
  0xff   :  { %v157_v20 = vmax.f32 %v153_v16, 0.0 }
 0x100   :  { %v158_v19 = vmax.f32 %v155_v18, 0.0 }
 0x102   :  { %262 = vmatprep.mubr.f32.mxu1 %v158_v19 }
 0x103   :  { %263 = vmatmul.mubr.f32.vlgmr.msra.gmra.mrb[0].mxu1 %v157_v20  ;;  %v471_v20 = vld [vmem:[%s1212_s9 + $0x70] sm:$0xff] }
 0x104   :  { %726 = vmatprep.mubr.msk.f32.mxu1 %vm954_vm1, %v952_v0  ;;  %822 = vmatpush3.bf16.msra.mxu1 %v821_v30  ;;  %v866_v22 = vpack.c.bf16 %v472_v21, %v471_v20 }
 0x105   :  { %823 = vmatprep.subr.bf16.mxu1 %v953_v55 }
 0x108   :  { %825 = vmatpush3.bf16.msra.mxu1 %v824_v32 }
 0x109   :  { %826 = vmatprep.subr.bf16.mxu1 %v953_v55 }
 0x10c   :  { %828 = vmatpush3.bf16.msra.mxu1 %v827_v35 }
 0x10d   :  { %829 = vmatprep.subr.bf16.mxu1 %v953_v55 }
 0x110   :  { %831 = vmatpush3.bf16.msra.mxu1 %v830_v38 }
 0x111   :  { %832 = vmatprep.subr.bf16.mxu1 %v953_v55 }
 0x114   :  { %834 = vmatpush3.bf16.msra.mxu1 %v833_v41 }
 0x115   :  { %835 = vmatprep.subr.bf16.mxu1 %v953_v55 }
 0x118   :  { %837 = vmatpush3.bf16.msra.mxu1 %v836_v44 }
 0x119   :  { %838 = vmatprep.subr.bf16.mxu1 %v953_v55 }
 0x11c   :  { %840 = vmatpush3.bf16.msra.mxu1 %v839_v47 }
 0x11d   :  { %841 = vmatprep.subr.bf16.mxu1 %v953_v55 }
 0x120   :  { %843 = vmatpush3.bf16.msra.mxu1 %v842_v57 }
 0x1d6   :  { %v605_v48 = vpop.f32.mrb[0].mxu1 }
 0x1d7   :  { %v606_v50 = vpop.f32.mrb[1].mxu1 }
 0x1d8   :  { %v607_v51 = vadd.f32 %v606_v50, %v605_v48 }
 0x1da   :  { %v265_v52 = vadd.f32 %v607_v51, %v569_v49 }
 0x1dc   :  { %v268_v53 = vmax.f32 %v265_v52, 0.0 }
 0x1de   :  { %692 = vmatmul.mubr.f32.vlgmr.msra.gmra.mrb[2].mxu0 %v268_v53 }
 0x1df   :  { %761 = vmatprep.mubr.msk.f32.mxu0 %vm954_vm1, %v952_v0  ;;  %v460_v0 = vld [vmem:[%s1212_s9 + $0x18] sm:$0xff]  ;;  %846 = vmatpush3.bf16.msra.mxu0 %v845_v61  ;;  %s920_s9 = scalar_lea.vmem %s559_s30, 128 }
 0x1e0   :  { %v848_v62 = vpack.c.bf16 %v460_v0, %v459_v60  ;;  %847 = vmatprep.subr.bf16.mxu0 %v953_v55  ;;  %p921_p2 = scmp.ne.s32.totalorder %s559_s30, %s920_s9  ;;  %p926_p4 = scmp.lt.s32.totalorder %s920_s9, %s920_s9 }
 0x1e2   :  { %p927_p5 = por %p926_p4, %p925_p3 }
 0x1e3   :  { %849 = vmatpush3.bf16.msra.mxu0 %v848_v62 }
 0x1e4   :  { %850 = vmatprep.subr.bf16.mxu0 %v953_v55  ;;  %p928_p6 = pnand %p927_p5, %p921_p2 }
 0x1e7   :  { %852 = vmatpush3.bf16.msra.mxu0 %v851_v2 }
 0x1e8   :  { %853 = vmatprep.subr.bf16.mxu0 %v953_v55 }
 0x1eb   :  { %855 = vmatpush3.bf16.msra.mxu0 %v854_v5 }
 0x1ec   :  { %856 = vmatprep.subr.bf16.mxu0 %v953_v55 }
 0x1ef   :  { %858 = vmatpush3.bf16.msra.mxu0 %v857_v8 }
 0x1f0   :  { %859 = vmatprep.subr.bf16.mxu0 %v953_v55 }
 0x1f3   :  { %861 = vmatpush3.bf16.msra.mxu0 %v860_v11 }
 0x1f4   :  { %862 = vmatprep.subr.bf16.mxu0 %v953_v55 }
 0x1f7   :  { %864 = vmatpush3.bf16.msra.mxu0 %v863_v14 }
 0x1f8   :  { %865 = vmatprep.subr.bf16.mxu0 %v953_v55  ;;  %v571_v55 = vld [vmem:[%s1211_s8] ss:$0 sm:$0xff] }
 0x1fb   :  { %867 = vmatpush3.bf16.msra.mxu0 %v866_v22 }
 0x2b1   :  { %v358_v16 = vpop.f32.mrb[2].mxu0 }
 0x2b2   :  { %v359_v17 = vadd.f32 %v570_v15, %v358_v16  ;;  %v693_v18 = vpop.f32.mrb[3].mxu0 }
 0x2b4   :  { %v362_v19 = vmax.f32 %v359_v17, 0.0 }
 0x2b6   :  { %727 = vmatmul.mubr.f32.vlgmr.msra.gmra.mrb[2].mxu1 %v362_v19 }
 0x389   :  { %v452_v23 = vpop.f32.mrb[2].mxu1 }
 0x38a   :  { %v453_v24 = vadd.f32 %v571_v55, %v452_v23  ;;  %v728_v25 = vpop.f32.mrb[3].mxu1 }
 0x38c   :  { %v456_v26 = vmax.f32 %v453_v24, 0.0 }
 0x38e   :  { %762 = vmatmul.mubr.f32.vlgmr.msra.gmra.mrb[4].mxu0 %v456_v26 }
 0x461   :  { %v546_v28 = vpop.f32.mrb[4].mxu0 }
 0x462   :  { %v547_v29 = vadd.f32 %v572_v27, %v546_v28  ;;  %v763_v30 = vpop.f32.mrb[5].mxu0 }
 0x464   :  { %551 = vst.msk [vmem:[#allocation7] sm:$0xff] %vm550_vm2, %v547_v29 }
 0x465   :  { %931 = shalt.err (!%p928_p6)
}
 0x466   :  { %s932_s1 = scalar_lea.hbm %s1214_s11, 128 }
 0x467   :  { %p933_p7 = scmp.ne.s32.totalorder %s1214_s11, %s932_s1  ;;  %p936_p8 = scmp.lt.u32.totalorder %s932_s1, %s1214_s11 }
 0x469   :  { %p938_p9 = pnand %p936_p8, %p933_p7 }
 0x46b   :  { %941 = shalt.err (!%p938_p9)
}
 0x46c   :  { %561 = dma.vmem_to_hbm [thread:$0]  %s559_s30, 128, %s1214_s11, [#allocation4]  }
 0x46d   :  { %946 = dma.done.wait [#allocation4], 128  }
 0x46e   :  { %947 = vsyncadd [#allocation4], 4294967168 }
 0x46f   :  { %565 = vsyncpa [#allocation3], 1 }
 0x470   :  { %566 = vsyncpa [#allocation6], 1 }
 0x471   :  { %567 = vsyncpa [#allocation4], 1 }

</bundles_post_ra>
